<compile_context>
chip_gen: v7x
topology: tpu7x:2x2x1
jax: 0.10.0
libtpu: 0.0.40
codegen_flags: <defaults>
</compile_context>

<pallas_src>
import functools

import jax
import jax.numpy as jnp
from jax.experimental import pallas as pl
from jax.experimental.pallas import tpu as pltpu


H_PAD = 128   # hidden dim padded to lane width
F_PAD = 128   # feature dim padded to lane width


# ----------------------------------------------------------------------------
# Pallas kernel: 2-layer GCN encoder, fused (encoder_to_decoder @ dec0) linear,
# PReLU, decoder output linear, and MSE loss — all in one VMEM-resident block.
# ----------------------------------------------------------------------------
def premodel_kernel(
    A_ref,        # [N, N]    bf16 dense 0/1 adjacency (symmetric)
    dinv_ref,     # [N, 1]    f32  D^{-1/2} with self loops (hoisted to host)
    xm_ref,       # [N, Fp]   f32  masked node features (zero-padded cols)
    x_ref,        # [N, Fp]   f32  original node features (MSE target, padded)
    w_enc0_ref,   # [Fp, Hp]  bf16
    b_enc0_ref,   # [1, Hp]   f32
    w_enc1_ref,   # [Hp, Hp]  bf16
    b_enc1_ref,   # [1, Hp]   f32
    w_fused_ref,  # [Hp, Hp]  bf16  (w_e2d @ w_dec0, fused on host)
    b_dec0_ref,   # [1, Hp]   f32
    prelu_ref,    # [1]       f32  PReLU slope (SMEM scalar)
    w_dec1_ref,   # [Hp, Fp]  bf16
    b_dec1_ref,   # [1, Fp]   f32
    loss_ref,     # [1, 1]    f32  output: MSE loss
    recon_ref,    # [N, Fp]   f32  output: attr_recon (lane-dense, padded)
    *, inv_denom,
):
    dinv = dinv_ref[...]                                  # [N, 1] f32
    A = A_ref[...]                                        # [N, N] bf16 (exact 0/1)

    def gcn_agg(h):
        # A_hat @ h == dinv * ((A + I) @ (dinv * h))
        #           == dinv * (A @ (dinv*h) + dinv*h)
        # -> no eye / A+I / A_hat materialization, single [N,N] matmul.
        th = dinv * h                                     # f32
        nb = jnp.dot(A, th.astype(jnp.bfloat16),
                     preferred_element_type=jnp.float32)
        return dinv * (nb + th)

    # --- GCN encoder layer 1 -------------------------------------------------
    h = jnp.dot(xm_ref[...].astype(jnp.bfloat16), w_enc0_ref[...],
                preferred_element_type=jnp.float32)
    h = gcn_agg(h) + b_enc0_ref[...]
    h = jnp.maximum(h, 0.0)                               # ReLU between layers

    # --- GCN encoder layer 2 -------------------------------------------------
    h = jnp.dot(h.astype(jnp.bfloat16), w_enc1_ref[...],
                preferred_element_type=jnp.float32)
    h = gcn_agg(h) + b_enc1_ref[...]                      # enc_rep

    # --- fused encoder_to_decoder + decoder Linear 1 -------------------------
    z = jnp.dot(h.astype(jnp.bfloat16), w_fused_ref[...],
                preferred_element_type=jnp.float32) + b_dec0_ref[...]
    a = prelu_ref[0]
    z = jnp.where(z > 0.0, z, a * z)                      # PReLU (Dropout=eval)

    # --- decoder Linear 2 (lane-dense output store) ---------------------------
    recon = jnp.dot(z.astype(jnp.bfloat16), w_dec1_ref[...],
                    preferred_element_type=jnp.float32) + b_dec1_ref[...]
    recon_ref[...] = recon

    # --- MSE loss; padded columns of recon and x are both zero ---------------
    diff = recon - x_ref[...]
    sq = diff * diff
    s = jnp.sum(sq, axis=1, keepdims=True)                # [N, 1] lane reduce
    s = jnp.sum(s, axis=0, keepdims=True)                 # [1, 1]
    loss_ref[...] = s * inv_denom                         # mean over real N*Fin


# ----------------------------------------------------------------------------
# Host-side glue.
# ----------------------------------------------------------------------------
def _pad2(x, rows, cols):
    r, c = x.shape
    assert rows >= r and cols >= c
    return jnp.pad(x, ((0, rows - r), (0, cols - c)))


def prepare_static(A, params):
    """One-time prep (per graph / per weight update): hoisted GCN norm,
    weight fusion, zero-padding to lane width, bf16 cast of MXU operands."""
    in_dim, hidden = params["w_enc0"].shape
    assert F_PAD >= in_dim and H_PAD >= hidden

    # Hoisted symmetric GCN normalization (A assumed symmetric).
    deg = jnp.sum(A, axis=1, keepdims=True) + 1.0         # self loops
    dinv = jax.lax.rsqrt(deg).astype(jnp.float32)         # [N, 1]
    A_bf16 = A.astype(jnp.bfloat16)                       # 0/1 -> exact in bf16

    # Fuse encoder_to_decoder with the first decoder linear (no nonlinearity).
    w_fused = params["w_e2d"] @ params["w_dec0"]

    pw = {
        "w_enc0": _pad2(params["w_enc0"], F_PAD, H_PAD).astype(jnp.bfloat16),
        "b_enc0": _pad2(params["b_enc0"], 1, H_PAD),
        "w_enc1": _pad2(params["w_enc1"], H_PAD, H_PAD).astype(jnp.bfloat16),
        "b_enc1": _pad2(params["b_enc1"], 1, H_PAD),
        "w_fused": _pad2(w_fused, H_PAD, H_PAD).astype(jnp.bfloat16),
        "b_dec0": _pad2(params["b_dec0"], 1, H_PAD),
        "prelu_a": params["prelu_a"],
        "w_dec1": _pad2(params["w_dec1"], H_PAD, F_PAD).astype(jnp.bfloat16),
        "b_dec1": _pad2(params["b_dec1"], 1, F_PAD),
    }
    return A_bf16, dinv, pw, in_dim


def premodel_pallas_forward(A_bf16, dinv, x_masked, x, pw, in_dim):
    N = x.shape[0]
    xm_p = _pad2(x_masked.astype(jnp.float32), N, F_PAD)
    x_p = _pad2(x.astype(jnp.float32), N, F_PAD)

    vmem = pl.BlockSpec(memory_space=pltpu.MemorySpace.VMEM)
    smem = pl.BlockSpec(memory_space=pltpu.MemorySpace.SMEM)
    inv_denom = 1.0 / float(N * in_dim)

    loss, recon_p = pl.pallas_call(
        functools.partial(premodel_kernel, inv_denom=inv_denom),
        out_shape=(
            jax.ShapeDtypeStruct((1, 1), jnp.float32),
            jax.ShapeDtypeStruct((N, F_PAD), jnp.float32),
        ),
        in_specs=[vmem, vmem, vmem, vmem,        # A, dinv, xm, x
                  vmem, vmem, vmem, vmem,        # enc0 W/b, enc1 W/b
                  vmem, vmem, smem,              # fused W, dec0 b, prelu slope
                  vmem, vmem],                   # dec1 W/b
        out_specs=(vmem, vmem),
    )(
        A_bf16, dinv, xm_p, x_p,
        pw["w_enc0"], pw["b_enc0"], pw["w_enc1"], pw["b_enc1"],
        pw["w_fused"], pw["b_dec0"], pw["prelu_a"],
        pw["w_dec1"], pw["b_dec1"],
    )
    return loss, recon_p[:, :in_dim]


# ----------------------------------------------------------------------------
# Parameter init, masking noise, dense adjacency (module-level glue).
# ----------------------------------------------------------------------------
def init_params(key, in_dim, hidden):
    def linear(k, fan_in, fan_out, bias=True):
        kw, kb = jax.random.split(k)
        bound = 1.0 / (fan_in ** 0.5)
        w = jax.random.uniform(kw, (fan_in, fan_out), jnp.float32, -bound, bound)
        b = (jax.random.uniform(kb, (1, fan_out), jnp.float32, -bound, bound)
             if bias else None)
        return w, b

    ks = jax.random.split(key, 6)
    w_enc0, b_enc0 = linear(ks[0], in_dim, hidden)
    w_enc1, b_enc1 = linear(ks[1], hidden, hidden)
    w_e2d, _ = linear(ks[2], hidden, hidden, bias=False)
    w_dec0, b_dec0 = linear(ks[3], hidden, hidden)
    w_dec1, b_dec1 = linear(ks[4], hidden, in_dim)
    return {
        "w_enc0": w_enc0, "b_enc0": b_enc0,
        "w_enc1": w_enc1, "b_enc1": b_enc1,
        "w_e2d": w_e2d,
        "w_dec0": w_dec0, "b_dec0": b_dec0,
        "prelu_a": jnp.full((1,), 0.25, jnp.float32),   # nn.PReLU default
        "w_dec1": w_dec1, "b_dec1": b_dec1,
        # enc_mask_token = nn.Parameter(torch.zeros(1, in_dim))
        "enc_mask_token": jnp.zeros((1, in_dim), jnp.float32),
    }


def encoding_mask_noise(key, x, enc_mask_token, mask_rate=0.3, replace_rate=0.1):
    num_nodes = x.shape[0]
    k1, k2, k3 = jax.random.split(key, 3)
    perm = jax.random.permutation(k1, num_nodes)
    num_mask = int(mask_rate * num_nodes)
    mask_nodes = perm[:num_mask]
    keep_nodes = perm[num_mask:]
    mask_token_rate = 1.0 - replace_rate
    num_noise = int(replace_rate * num_mask)

    out_x = x
    if replace_rate > 0 and num_noise > 0:
        perm_mask = jax.random.permutation(k2, num_mask)
        token_nodes = mask_nodes[perm_mask[: int(mask_token_rate * num_mask)]]
        noise_nodes = mask_nodes[perm_mask[-num_noise:]]
        noise_chosen = jax.random.permutation(k3, num_nodes)[:num_noise]
        out_x = out_x.at[token_nodes].set(0.0)
        out_x = out_x.at[noise_nodes].set(x[noise_chosen])
    else:
        token_nodes = mask_nodes
        out_x = out_x.at[mask_nodes].set(0.0)
    out_x = out_x.at[token_nodes].add(enc_mask_token[0])
    return out_x, (mask_nodes, keep_nodes)


def to_dense_adj(edge_index, num_nodes):
    A = jnp.zeros((num_nodes, num_nodes), jnp.float32)
    return A.at[edge_index[0], edge_index[1]].set(1.0)


def reference_forward(A, x_masked, x, p):
    # Pure-JAX f32 reference of the original (unfused, unpadded) module math.
    N = A.shape[0]
    A_sl = A + jnp.eye(N, dtype=A.dtype)
    dinv = 1.0 / jnp.sqrt(jnp.sum(A_sl, axis=1, keepdims=True))
    A_hat = A_sl * dinv * dinv.T
    h = jnp.maximum(A_hat @ (x_masked @ p["w_enc0"]) + p["b_enc0"], 0.0)
    h = A_hat @ (h @ p["w_enc1"]) + p["b_enc1"]
    rep = h @ p["w_e2d"]
    z = rep @ p["w_dec0"] + p["b_dec0"]
    z = jnp.where(z > 0, z, p["prelu_a"][0] * z)
    recon = z @ p["w_dec1"] + p["b_dec1"]
    return jnp.mean((recon - x) ** 2), recon


def main():
    # Small, deterministic problem: N=64 nodes, in_dim=32, num_hidden=32,
    # encoder_num_layers=2, nhead=nhead_out=4 (32 % 4 == 0 as asserted).
    N, in_dim, hidden = 64, 32, 32
    key = jax.random.PRNGKey(0)
    k_x, k_mask, k_param = jax.random.split(key, 3)

    x = jax.random.normal(k_x, (N, in_dim), jnp.float32)

    # Deterministic symmetric ring graph -> edge_index [2, 2N]
    src = jnp.arange(N, dtype=jnp.int32)
    dst = (src + 1) % N
    edge_index = jnp.stack(
        [jnp.concatenate([src, dst]), jnp.concatenate([dst, src])], axis=0
    )

    params = init_params(k_param, in_dim, hidden)

    # mask_attr_prediction glue (drop_edge_rate=0, drop_path_rate=0):
    #   use_edge_index = intersection(edge_index, edge_index) = edge_index
    A = to_dense_adj(edge_index, N)
    x_masked, (mask_nodes, keep_nodes) = encoding_mask_noise(
        k_mask, x, params["enc_mask_token"], mask_rate=0.3, replace_rate=0.1
    )
    x_masked = x_masked.astype(jnp.float32)

    # One-time prep (hoisted normalization, weight fusion, padding, bf16 cast).
    A_bf16, dinv, pw, _ = prepare_static(A, params)

    loss, recon = premodel_pallas_forward(A_bf16, dinv, x_masked, x, pw, in_dim)
    loss = jax.block_until_ready(loss)
    recon = jax.block_until_ready(recon)

    # Correctness check against the pure-f32 reference (bf16 MXU operands in
    # the kernel => loose tolerance; accumulation is f32).
    ref_loss, ref_recon = reference_forward(A, x_masked, x, params)
    assert jnp.allclose(loss[0, 0], ref_loss, rtol=5e-2, atol=5e-2), (
        float(loss[0, 0]), float(ref_loss))
    assert jnp.allclose(recon, ref_recon, rtol=5e-2, atol=5e-2)

    # PreModel.forward returns (loss, {'loss': loss.item()}, final_edge_mask_rate)
    final_edge_mask_rate = 0  # struct branch statically skipped (drop rates = 0)
    loss_item = {"loss": float(loss[0, 0])}
    _ = (loss, loss_item, final_edge_mask_rate)

    print("KERNEL_OK")


if __name__ == "__main__":
    main()
</pallas_src>

<mosaic_0001>
module attributes {stable_mosaic.version = 11 : i64} {
  func.func @premodel_kernel(%arg0: memref<64x64xbf16, #tpu.memory_space<vmem>>, %arg1: memref<64x1xf32, #tpu.memory_space<vmem>>, %arg2: memref<64x128xf32, #tpu.memory_space<vmem>>, %arg3: memref<64x128xf32, #tpu.memory_space<vmem>>, %arg4: memref<128x128xbf16, #tpu.memory_space<vmem>>, %arg5: memref<1x128xf32, #tpu.memory_space<vmem>>, %arg6: memref<128x128xbf16, #tpu.memory_space<vmem>>, %arg7: memref<1x128xf32, #tpu.memory_space<vmem>>, %arg8: memref<128x128xbf16, #tpu.memory_space<vmem>>, %arg9: memref<1x128xf32, #tpu.memory_space<vmem>>, %arg10: memref<1xf32, #tpu.memory_space<smem>>, %arg11: memref<128x128xbf16, #tpu.memory_space<vmem>>, %arg12: memref<1x128xf32, #tpu.memory_space<vmem>>, %arg13: memref<1x1xf32, #tpu.memory_space<vmem>>, %arg14: memref<64x128xf32, #tpu.memory_space<vmem>>) attributes {dimension_semantics = [], scalar_prefetch = 0 : i64, scratch_operands = 0 : i64, tpu.core_type = #tpu.core_type<tc>} {
    %c0 = arith.constant 0 : index
    %c0_0 = arith.constant 0 : index
    %0 = vector.load %arg1[%c0, %c0_0] : memref<64x1xf32, #tpu.memory_space<vmem>>, vector<64x1xf32>
    %c0_1 = arith.constant 0 : index
    %c0_2 = arith.constant 0 : index
    %1 = vector.load %arg0[%c0_1, %c0_2] : memref<64x64xbf16, #tpu.memory_space<vmem>>, vector<64x64xbf16>
    %c0_3 = arith.constant 0 : index
    %c0_4 = arith.constant 0 : index
    %2 = vector.load %arg2[%c0_3, %c0_4] : memref<64x128xf32, #tpu.memory_space<vmem>>, vector<64x128xf32>
    %3 = arith.truncf %2 : vector<64x128xf32> to vector<64x128xbf16>
    %c0_5 = arith.constant 0 : index
    %c0_6 = arith.constant 0 : index
    %4 = vector.load %arg4[%c0_5, %c0_6] : memref<128x128xbf16, #tpu.memory_space<vmem>>, vector<128x128xbf16>
    %cst = arith.constant dense<0.000000e+00> : vector<64x128xf32>
    %5 = tpu.matmul %3, %4, %cst {dimension_numbers = #tpu.dot_dimension_numbers<[1], [0], [0], [1], [0, 0, 1, 1], [], []>} : vector<64x128xbf16>, vector<128x128xbf16>, vector<64x128xf32> -> vector<64x128xf32>
    %6 = vector.broadcast %0 : vector<64x1xf32> to vector<64x128xf32>
    %7 = arith.mulf %6, %5 : vector<64x128xf32>
    %8 = arith.truncf %7 : vector<64x128xf32> to vector<64x128xbf16>
    %cst_7 = arith.constant dense<0.000000e+00> : vector<64x128xf32>
    %9 = tpu.matmul %1, %8, %cst_7 {dimension_numbers = #tpu.dot_dimension_numbers<[1], [0], [0], [1], [0, 0, 1, 1], [], []>} : vector<64x64xbf16>, vector<64x128xbf16>, vector<64x128xf32> -> vector<64x128xf32>
    %10 = arith.addf %9, %7 : vector<64x128xf32>
    %11 = vector.broadcast %0 : vector<64x1xf32> to vector<64x128xf32>
    %12 = arith.mulf %11, %10 : vector<64x128xf32>
    %c0_8 = arith.constant 0 : index
    %c0_9 = arith.constant 0 : index
    %13 = vector.load %arg5[%c0_8, %c0_9] : memref<1x128xf32, #tpu.memory_space<vmem>>, vector<1x128xf32>
    %14 = vector.broadcast %13 : vector<1x128xf32> to vector<64x128xf32>
    %15 = arith.addf %12, %14 : vector<64x128xf32>
    %cst_10 = arith.constant 0.000000e+00 : f32
    %16 = vector.broadcast %cst_10 : f32 to vector<64x128xf32>
    %17 = arith.maximumf %15, %16 : vector<64x128xf32>
    %18 = arith.truncf %17 : vector<64x128xf32> to vector<64x128xbf16>
    %c0_11 = arith.constant 0 : index
    %c0_12 = arith.constant 0 : index
    %19 = vector.load %arg6[%c0_11, %c0_12] : memref<128x128xbf16, #tpu.memory_space<vmem>>, vector<128x128xbf16>
    %cst_13 = arith.constant dense<0.000000e+00> : vector<64x128xf32>
    %20 = tpu.matmul %18, %19, %cst_13 {dimension_numbers = #tpu.dot_dimension_numbers<[1], [0], [0], [1], [0, 0, 1, 1], [], []>} : vector<64x128xbf16>, vector<128x128xbf16>, vector<64x128xf32> -> vector<64x128xf32>
    %21 = vector.broadcast %0 : vector<64x1xf32> to vector<64x128xf32>
    %22 = arith.mulf %21, %20 : vector<64x128xf32>
    %23 = arith.truncf %22 : vector<64x128xf32> to vector<64x128xbf16>
    %cst_14 = arith.constant dense<0.000000e+00> : vector<64x128xf32>
    %24 = tpu.matmul %1, %23, %cst_14 {dimension_numbers = #tpu.dot_dimension_numbers<[1], [0], [0], [1], [0, 0, 1, 1], [], []>} : vector<64x64xbf16>, vector<64x128xbf16>, vector<64x128xf32> -> vector<64x128xf32>
    %25 = arith.addf %24, %22 : vector<64x128xf32>
    %26 = vector.broadcast %0 : vector<64x1xf32> to vector<64x128xf32>
    %27 = arith.mulf %26, %25 : vector<64x128xf32>
    %c0_15 = arith.constant 0 : index
    %c0_16 = arith.constant 0 : index
    %28 = vector.load %arg7[%c0_15, %c0_16] : memref<1x128xf32, #tpu.memory_space<vmem>>, vector<1x128xf32>
    %29 = vector.broadcast %28 : vector<1x128xf32> to vector<64x128xf32>
    %30 = arith.addf %27, %29 : vector<64x128xf32>
    %31 = arith.truncf %30 : vector<64x128xf32> to vector<64x128xbf16>
    %c0_17 = arith.constant 0 : index
    %c0_18 = arith.constant 0 : index
    %32 = vector.load %arg8[%c0_17, %c0_18] : memref<128x128xbf16, #tpu.memory_space<vmem>>, vector<128x128xbf16>
    %cst_19 = arith.constant dense<0.000000e+00> : vector<64x128xf32>
    %33 = tpu.matmul %31, %32, %cst_19 {dimension_numbers = #tpu.dot_dimension_numbers<[1], [0], [0], [1], [0, 0, 1, 1], [], []>} : vector<64x128xbf16>, vector<128x128xbf16>, vector<64x128xf32> -> vector<64x128xf32>
    %c0_20 = arith.constant 0 : index
    %c0_21 = arith.constant 0 : index
    %34 = vector.load %arg9[%c0_20, %c0_21] : memref<1x128xf32, #tpu.memory_space<vmem>>, vector<1x128xf32>
    %35 = vector.broadcast %34 : vector<1x128xf32> to vector<64x128xf32>
    %36 = arith.addf %33, %35 : vector<64x128xf32>
    %c0_22 = arith.constant 0 : index
    %37 = memref.load %arg10[%c0_22] : memref<1xf32, #tpu.memory_space<smem>>
    %cst_23 = arith.constant 0.000000e+00 : f32
    %38 = vector.broadcast %cst_23 : f32 to vector<64x128xf32>
    %39 = arith.cmpf ogt, %36, %38 : vector<64x128xf32>
    %40 = vector.broadcast %37 : f32 to vector<64x128xf32>
    %41 = arith.mulf %40, %36 : vector<64x128xf32>
    %42 = arith.select %39, %36, %41 : vector<64x128xi1>, vector<64x128xf32>
    %43 = arith.truncf %42 : vector<64x128xf32> to vector<64x128xbf16>
    %c0_24 = arith.constant 0 : index
    %c0_25 = arith.constant 0 : index
    %44 = vector.load %arg11[%c0_24, %c0_25] : memref<128x128xbf16, #tpu.memory_space<vmem>>, vector<128x128xbf16>
    %cst_26 = arith.constant dense<0.000000e+00> : vector<64x128xf32>
    %45 = tpu.matmul %43, %44, %cst_26 {dimension_numbers = #tpu.dot_dimension_numbers<[1], [0], [0], [1], [0, 0, 1, 1], [], []>} : vector<64x128xbf16>, vector<128x128xbf16>, vector<64x128xf32> -> vector<64x128xf32>
    %c0_27 = arith.constant 0 : index
    %c0_28 = arith.constant 0 : index
    %46 = vector.load %arg12[%c0_27, %c0_28] : memref<1x128xf32, #tpu.memory_space<vmem>>, vector<1x128xf32>
    %47 = vector.broadcast %46 : vector<1x128xf32> to vector<64x128xf32>
    %48 = arith.addf %45, %47 : vector<64x128xf32>
    %c0_29 = arith.constant 0 : index
    %c0_30 = arith.constant 0 : index
    %49 = vector.load %arg14[%c0_29, %c0_30] : memref<64x128xf32, #tpu.memory_space<vmem>>, vector<64x128xf32>
    tpu.vector_store %arg14[%c0_29, %c0_30], %48 {strides = array<i32>} : memref<64x128xf32, #tpu.memory_space<vmem>>, vector<64x128xf32>,
    %c0_31 = arith.constant 0 : index
    %c0_32 = arith.constant 0 : index
    %50 = vector.load %arg3[%c0_31, %c0_32] : memref<64x128xf32, #tpu.memory_space<vmem>>, vector<64x128xf32>
    %51 = arith.subf %48, %50 : vector<64x128xf32>
    %52 = arith.mulf %51, %51 : vector<64x128xf32>
    %cst_33 = arith.constant dense<0.000000e+00> : vector<64xf32>
    %53 = vector.multi_reduction <add>, %52, %cst_33 [1] : vector<64x128xf32> to vector<64xf32>
    %54 = vector.shape_cast %53 : vector<64xf32> to vector<64x1xf32>
    %cst_34 = arith.constant dense<0.000000e+00> : vector<1xf32>
    %55 = vector.multi_reduction <add>, %54, %cst_34 [0] : vector<64x1xf32> to vector<1xf32>
    %56 = vector.shape_cast %55 : vector<1xf32> to vector<1x1xf32>
    %cst_35 = arith.constant 4.8828125E-4 : f32
    %57 = vector.broadcast %cst_35 : f32 to vector<1x1xf32>
    %58 = arith.mulf %56, %57 : vector<1x1xf32>
    %c0_36 = arith.constant 0 : index
    %c0_37 = arith.constant 0 : index
    %59 = vector.load %arg13[%c0_36, %c0_37] : memref<1x1xf32, #tpu.memory_space<vmem>>, vector<1x1xf32>
    tpu.vector_store %arg13[%c0_36, %c0_37], %58 {strides = array<i32>} : memref<1x1xf32, #tpu.memory_space<vmem>>, vector<1x1xf32>,
    return
  }
}

</mosaic_0001>

<bundles_post_ra>
// kernel: tpu_custom_call.1
= control target key start
LH: loop header
LB: loop body
LE: loop exit
PB: predicated region body
PF: predicated region fallthrough
CT: control target
= control target key end

     0   :  { %21 = vsyncpa [#allocation4], 0  ;;  %s1974_s0 = inlined_call_operand.hbm [shape: bf16[64,64], index: 0, kind: input, shape index: {}]   ;;  %s1975_s1 = inlined_call_operand.vmem [shape: f32[64,1], index: 1, kind: input, shape index: {}]   ;;  %s1976_s2 = inlined_call_operand.vmem [shape: f32[64,128], index: 2, kind: input, shape index: {}]   ;;  %s1977_s3 = inlined_call_operand.hbm [shape: f32[64,128], index: 3, kind: input, shape index: {}]   ;;  %s1978_s4 = inlined_call_operand.hbm [shape: bf16[128,128], index: 4, kind: input, shape index: {}]   ;;  %s1979_s5 = inlined_call_operand.vmem [shape: f32[1,128], index: 5, kind: input, shape index: {}]   ;;  %s1980_s6 = inlined_call_operand.hbm [shape: bf16[128,128], index: 6, kind: input, shape index: {}]   ;;  %s1981_s7 = inlined_call_operand.vmem [shape: f32[1,128], index: 7, kind: input, shape index: {}]   ;;  %s1982_s8 = inlined_call_operand.hbm [shape: bf16[128,128], index: 8, kind: input, shape index: {}]   ;;  %s1983_s9 = inlined_call_operand.vmem [shape: f32[1,128], index: 9, kind: input, shape index: {}]   ;;  %s1984_s10 = inlined_call_operand.<no memory space> [shape: f32[1], index: 10, kind: input, shape index: {}]   ;;  %s1985_s11 = inlined_call_operand.hbm [shape: bf16[128,128], index: 11, kind: input, shape index: {}]   ;;  %s1986_s12 = inlined_call_operand.vmem [shape: f32[1,128], index: 12, kind: input, shape index: {}]   ;;  %s1987_s13 = inlined_call_operand.hbm [shape: f32[1,1], index: 13, kind: output, shape index: {0}]   ;;  %s1988_s14 = inlined_call_operand.hbm [shape: f32[64,128], index: 14, kind: output, shape index: {1}]  }
   0x1   :  { %22 = vsyncpa [#allocation7], 0 }
   0x2   :  { %23 = vsyncpa [#allocation10], 0 }
   0x3   :  { %24 = vsyncpa [#allocation13], 0 }
   0x4   :  { %25 = vsyncpa [#allocation5], 0 }
   0x5   :  { %26 = vsyncpa [#allocation16], 0  ;;  %s1586_s29 = smov [#allocation6]   ;;  %s1398_s17 = scalar_lea.hbm %s1977_s3, 1024 }
   0x6   :  { %s48_s30 = sshll.u32 %s1586_s29, 4  ;;  %p1399_p0 = scmp.ne.s32.totalorder %s1977_s3, %s1398_s17  ;;  %s49_s30 = int_to_ptr.vmem [resolvable:$true] %s48_s30 }
   0x7   :  { %p1402_p1 = scmp.lt.u32.totalorder %s1398_s17, %s1977_s3 }
   0x9   :  { %p1404_p2 = pnand %p1402_p1, %p1399_p0 }
   0xb   :  { %1407 = shalt.err (!%p1404_p2)
}
   0xc   :  { %s1408_s22 = scalar_lea.vmem %s49_s30, 1024  ;;  %p1413_p4 = scmp.lt.s32.totalorder %s49_s30, %s49_s30 }
   0xd   :  { %p1409_p3 = scmp.ne.s32.totalorder %s49_s30, %s1408_s22  ;;  %p1414_p5 = scmp.lt.s32.totalorder %s1408_s22, %s1408_s22 }
   0xf   :  { %p1415_p6 = por %p1414_p5, %p1413_p4 }
  0x11   :  { %p1416_p7 = pnand %p1415_p6, %p1409_p3 }
  0x13   :  { %1419 = shalt.err (!%p1416_p7)
}
  0x14   :  { %s1587_s23 = smov 128   ;;  %s1588_s24 = smov 8  }
  0x15   :  { %54 = dma.hbm_to_vmem [thread:$0]  %s1977_s3, 1024, %s49_s30, [#allocation7], %s1587_s23, %s1587_s23, %s1588_s24  }
  0x16   :  { %s1589_s27 = smov [#allocation9]   ;;  %s1590_s29 = smov [#allocation3]  }
  0x17   :  { %s74_s28 = sshll.u32 %s1589_s27, 4  ;;  %s32_s15 = sshll.u32 %s1590_s29, 4  ;;  %s75_s28 = int_to_ptr.vmem [resolvable:$true] %s74_s28  ;;  %s33_s15 = int_to_ptr.vmem [resolvable:$true] %s32_s15 }
  0x18   :  { %s1420_s18 = scalar_lea.hbm %s1980_s6, 1024 }
  0x19   :  { %p1421_p8 = scmp.ne.s32.totalorder %s1980_s6, %s1420_s18  ;;  %p1424_p9 = scmp.lt.u32.totalorder %s1420_s18, %s1980_s6 }
  0x1b   :  { %p1426_p10 = pnand %p1424_p9, %p1421_p8 }
  0x1d   :  { %1429 = shalt.err (!%p1426_p10)
}
  0x1e   :  { %s1430_s3 = scalar_lea.vmem %s75_s28, 1024  ;;  %p1435_p12 = scmp.lt.s32.totalorder %s75_s28, %s75_s28 }
  0x1f   :  { %p1431_p11 = scmp.ne.s32.totalorder %s75_s28, %s1430_s3  ;;  %p1436_p13 = scmp.lt.s32.totalorder %s1430_s3, %s1430_s3 }
  0x21   :  { %p1437_p0 = por %p1436_p13, %p1435_p12 }
  0x23   :  { %p1438_p1 = pnand %p1437_p0, %p1431_p11 }
  0x25   :  { %1441 = shalt.err (!%p1438_p1)
}
  0x26   :  { %s1591_s30 = smov 64   ;;  %s1592_s25 = smov 4  }
  0x27   :  { %80 = dma.hbm_to_vmem [thread:$0]  %s1980_s6, 1024, %s75_s28, [#allocation10], %s1591_s30, %s1591_s30, %s1592_s25  }
  0x28   :  { %s1442_s17 = scalar_lea.hbm %s1974_s0, 512 }
  0x29   :  { %p1443_p2 = scmp.ne.s32.totalorder %s1974_s0, %s1442_s17  ;;  %p1446_p3 = scmp.lt.u32.totalorder %s1442_s17, %s1974_s0 }
  0x2b   :  { %p1448_p4 = pnand %p1446_p3, %p1443_p2 }
  0x2d   :  { %1451 = shalt.err (!%p1448_p4)
}
  0x2e   :  { %s1452_s22 = scalar_lea.vmem %s33_s15, 512  ;;  %p1457_p6 = scmp.lt.s32.totalorder %s33_s15, %s33_s15 }
  0x2f   :  { %p1453_p5 = scmp.ne.s32.totalorder %s33_s15, %s1452_s22  ;;  %p1458_p7 = scmp.lt.s32.totalorder %s1452_s22, %s1452_s22 }
  0x31   :  { %p1459_p8 = por %p1458_p7, %p1457_p6 }
  0x33   :  { %p1460_p9 = pnand %p1459_p8, %p1453_p5 }
  0x35   :  { %1463 = shalt.err (!%p1460_p9)
}
  0x36   :  { %38 = dma.hbm_to_vmem [thread:$0]  %s1974_s0, 512, %s33_s15, [#allocation4], %s1591_s30, %s1591_s30, %s1592_s25  }
  0x37   :  { %s1593_s3 = smov [#allocation8]   ;;  %s1594_s27 = smov [#allocation11]  }
  0x38   :  { %s60_s26 = sshll.u32 %s1593_s3, 4  ;;  %s88_s29 = sshll.u32 %s1594_s27, 4  ;;  %s61_s26 = int_to_ptr.vmem [resolvable:$true] %s60_s26  ;;  %s89_s29 = int_to_ptr.vmem [resolvable:$true] %s88_s29 }
  0x39   :  { %s1464_s18 = scalar_lea.hbm %s1978_s4, 1024 }
  0x3a   :  { %p1465_p10 = scmp.ne.s32.totalorder %s1978_s4, %s1464_s18  ;;  %p1468_p11 = scmp.lt.u32.totalorder %s1464_s18, %s1978_s4 }
  0x3c   :  { %p1470_p12 = pnand %p1468_p11, %p1465_p10 }
  0x3e   :  { %1473 = shalt.err (!%p1470_p12)
}
  0x3f   :  { %s1474_s0 = scalar_lea.vmem %s61_s26, 1024  ;;  %p1479_p0 = scmp.lt.s32.totalorder %s61_s26, %s61_s26 }
  0x40   :  { %p1475_p13 = scmp.ne.s32.totalorder %s61_s26, %s1474_s0  ;;  %p1480_p1 = scmp.lt.s32.totalorder %s1474_s0, %s1474_s0 }
  0x42   :  { %p1481_p2 = por %p1480_p1, %p1479_p0 }
  0x44   :  { %p1482_p3 = pnand %p1481_p2, %p1475_p13 }
  0x46   :  { %1485 = shalt.err (!%p1482_p3)
}
  0x47   :  { %66 = dma.hbm_to_vmem [thread:$0]  %s1978_s4, 1024, %s61_s26, [#allocation7], %s1591_s30, %s1591_s30, %s1592_s25  }
  0x48   :  { %s1486_s27 = scalar_lea.hbm %s1982_s8, 1024 }
  0x49   :  { %p1487_p4 = scmp.ne.s32.totalorder %s1982_s8, %s1486_s27  ;;  %p1490_p5 = scmp.lt.u32.totalorder %s1486_s27, %s1982_s8 }
  0x4b   :  { %p1492_p6 = pnand %p1490_p5, %p1487_p4 }
  0x4d   :  { %1495 = shalt.err (!%p1492_p6)
}
  0x4e   :  { %s1496_s20 = scalar_lea.vmem %s89_s29, 1024  ;;  %p1501_p8 = scmp.lt.s32.totalorder %s89_s29, %s89_s29 }
  0x4f   :  { %p1497_p7 = scmp.ne.s32.totalorder %s89_s29, %s1496_s20  ;;  %p1502_p9 = scmp.lt.s32.totalorder %s1496_s20, %s1496_s20 }
  0x51   :  { %p1503_p10 = por %p1502_p9, %p1501_p8 }
  0x53   :  { %p1504_p11 = pnand %p1503_p10, %p1497_p7 }
  0x55   :  { %1507 = shalt.err (!%p1504_p11)
}
  0x56   :  { %94 = dma.hbm_to_vmem [thread:$0]  %s1982_s8, 1024, %s89_s29, [#allocation10], %s1591_s30, %s1591_s30, %s1592_s25  }
  0x57   :  { %s1595_s21 = smov [#allocation12]   ;;  %s1508_s6 = scalar_lea.hbm %s1985_s11, 1024 }
  0x58   :  { %s104_s22 = sshll.u32 %s1595_s21, 4  ;;  %p1509_p12 = scmp.ne.s32.totalorder %s1985_s11, %s1508_s6  ;;  %s105_s22 = int_to_ptr.vmem [resolvable:$true] %s104_s22 }
  0x59   :  { %p1512_p13 = scmp.lt.u32.totalorder %s1508_s6, %s1985_s11 }
  0x5b   :  { %p1514_p0 = pnand %p1512_p13, %p1509_p12 }
  0x5d   :  { %1517 = shalt.err (!%p1514_p0)
}
  0x5e   :  { %s1518_s17 = scalar_lea.vmem %s105_s22, 1024  ;;  %p1523_p2 = scmp.lt.s32.totalorder %s105_s22, %s105_s22 }
  0x5f   :  { %p1519_p1 = scmp.ne.s32.totalorder %s105_s22, %s1518_s17  ;;  %p1524_p3 = scmp.lt.s32.totalorder %s1518_s17, %s1518_s17 }
  0x61   :  { %p1525_p4 = por %p1524_p3, %p1523_p2 }
  0x63   :  { %p1526_p5 = pnand %p1525_p4, %p1519_p1 }
  0x65   :  { %1529 = shalt.err (!%p1526_p5)
}
  0x66   :  { %110 = dma.hbm_to_vmem [thread:$0]  %s1985_s11, 1024, %s105_s22, [#allocation13], %s1591_s30, %s1591_s30, %s1592_s25  }
  0x67   :  { %1574 = dma.done.wait [#allocation4], 512  }
  0x68   :  { %1575 = vsyncadd [#allocation4], 4294966784 }
  0x69   :  { %1576 = dma.done.wait [#allocation7], 2048  }
  0x6a   :  { %1577 = vsyncadd [#allocation7], 4294965248 }
  0x6b   :  { %1578 = dma.done.wait [#allocation10], 2048  }
  0x6c   :  { %1579 = vsyncadd [#allocation10], 4294965248 }
  0x6d   :  { %1580 = dma.done.wait [#allocation13], 1024  }
  0x6e   :  { %1581 = vsyncadd [#allocation13], 4294966272  ;;  %v1596_v0 = vmov 0   ;;  %v1362_v1 = vld [vmem:[#allocation8] sm:$0xff]   ;;  %v1363_v2 = vld [vmem:[#allocation8 + $0x8] sm:$0xff]   ;;  %vm361_vm0 = vcmask 523264  }
  0x6f   :  { %1360 = vset.pattern.permute.xlu0 %v1596_v0  ;;  %1361 = vset.pattern.permute.xlu1 %v1596_v0  ;;  %v1364_v3 = vld [vmem:[#allocation8 + $0x10] sm:$0xff]   ;;  %v1365_v4 = vld [vmem:[#allocation8 + $0x18] sm:$0xff]   ;;  %v148_v5 = vld [vmem:[%s1976_s2] sm:$0xff] }
  0x70   :  { %1219 = vmatprep.subr.bf16.mxu0 %v1362_v1  ;;  %v149_v6 = vld [vmem:[%s1976_s2 + $0x8] sm:$0xff]  ;;  %v132_v8 = vld [vmem:[%s1975_s1] sm:$0xff]  ;;  %v134_v9 = vld [vmem:[%s1975_s1 + $0x10] sm:$0xff] }
  0x71   :  { %1220 = vmatpush3.bf16.msra.mxu0 %v1362_v1  ;;  %v156_v7 = vpack.c.bf16 %v149_v6, %v148_v5  ;;  %v1366_v10 = vld [vmem:[#allocation8 + $0x20] sm:$0xff]   ;;  %291 = vperm.xlu0 %1360, %v132_v8   ;;  %v133_v11 = vld [vmem:[%s1975_s1 + $0x8] sm:$0xff]  ;;  %v135_v12 = vld [vmem:[%s1975_s1 + $0x18] sm:$0xff] }
  0x72   :  { %1221 = vmatprep.subr.bf16.mxu0 %v1363_v2  ;;  %301 = vperm.xlu1 %1361, %v134_v9   ;;  %v1367_v13 = vld [vmem:[#allocation8 + $0x28] sm:$0xff]   ;;  %v136_v14 = vld [vmem:[%s1975_s1 + $0x20] sm:$0xff]  ;;  %v1368_v16 = vld [vmem:[#allocation8 + $0x30] sm:$0xff]  }
  0x73   :  { %1235 = vmatprep.mubr.bf16.mxu0 %v156_v7  ;;  %v137_v15 = vld [vmem:[%s1975_s1 + $0x28] sm:$0xff]  ;;  %v138_v17 = vld [vmem:[%s1975_s1 + $0x30] sm:$0xff]  ;;  %v139_v18 = vld [vmem:[%s1975_s1 + $0x38] sm:$0xff] }
  0x74   :  { %v1369_v19 = vld [vmem:[#allocation8 + $0x38] sm:$0xff]   ;;  %v150_v20 = vld [vmem:[%s1976_s2 + $0x10] sm:$0xff]  ;;  %v152_v22 = vld [vmem:[%s1976_s2 + $0x20] sm:$0xff] }
  0x75   :  { %1222 = vmatpush3.bf16.msra.mxu0 %v1363_v2  ;;  %296 = vperm.xlu0 %1360, %v133_v11   ;;  %v151_v21 = vld [vmem:[%s1976_s2 + $0x18] sm:$0xff]  ;;  %v153_v23 = vld [vmem:[%s1976_s2 + $0x28] sm:$0xff]  ;;  %v154_v26 = vld [vmem:[%s1976_s2 + $0x30] sm:$0xff] }
  0x76   :  { %1223 = vmatprep.subr.bf16.mxu0 %v1364_v3  ;;  %306 = vperm.xlu1 %1361, %v135_v12   ;;  %v157_v24 = vpack.c.bf16 %v151_v21, %v150_v20  ;;  %v158_v25 = vpack.c.bf16 %v153_v23, %v152_v22  ;;  %v155_v27 = vld [vmem:[%s1976_s2 + $0x38] sm:$0xff]  ;;  %v1370_v29 = vld [vmem:[#allocation3] sm:$0xff]   ;;  %v1853_v59 = vld [vmem:[#allocation3 + $0x8] sm:$0xff]  }
  0x77   :  { %v159_v28 = vpack.c.bf16 %v155_v27, %v154_v26  ;;  %1251 = vmatprep.mubr.msk.bf16.mxu1 %vm361_vm0, %v1370_v29  ;;  %v1374_v58 = vld [vmem:[#allocation9] sm:$0xff]   ;;  %v1855_v60 = vld [vmem:[#allocation3 + $0x10] sm:$0xff]   ;;  %v1375_v61 = vld [vmem:[#allocation9 + $0x8] sm:$0xff]  }
  0x78   :  { %v1376_v62 = vld [vmem:[#allocation9 + $0x10] sm:$0xff]   ;;  %v1861_v63 = vld [vmem:[#allocation3 + $0x18] sm:$0xff]   ;;  %v1378_v1 = vld [vmem:[#allocation9 + $0x20] sm:$0xff]  }
  0x79   :  { %1224 = vmatpush3.bf16.msra.mxu0 %v1364_v3  ;;  %311 = vperm.xlu0 %1360, %v136_v14   ;;  %v1377_v0 = vld [vmem:[#allocation9 + $0x18] sm:$0xff]   ;;  %v1379_v2 = vld [vmem:[#allocation9 + $0x28] sm:$0xff]   ;;  %v1380_v3 = vld [vmem:[#allocation9 + $0x30] sm:$0xff]  }
  0x7a   :  { %1225 = vmatprep.subr.bf16.mxu0 %v1365_v4  ;;  %316 = vperm.xlu1 %1361, %v137_v15   ;;  %v1123_v8 = vld [vmem:[%s1979_s5] ss:$0 sm:$0xff] }
  0x7d   :  { %1226 = vmatpush3.bf16.msra.mxu0 %v1365_v4  ;;  %321 = vperm.xlu0 %1360, %v138_v17   ;;  %v1381_v4 = vld [vmem:[#allocation9 + $0x38] sm:$0xff]  }
  0x7e   :  { %1227 = vmatprep.subr.bf16.mxu0 %v1366_v10  ;;  %326 = vperm.xlu1 %1361, %v139_v18  }
  0x81   :  { %1228 = vmatpush3.bf16.msra.mxu0 %v1366_v10 }
  0x82   :  { %1229 = vmatprep.subr.bf16.mxu0 %v1367_v13 }
  0x85   :  { %1230 = vmatpush3.bf16.msra.mxu0 %v1367_v13 }
  0x86   :  { %1231 = vmatprep.subr.bf16.mxu0 %v1368_v16 }
  0x89   :  { %1232 = vmatpush3.bf16.msra.mxu0 %v1368_v16 }
  0x8a   :  { %1233 = vmatprep.subr.bf16.mxu0 %v1369_v19 }
  0x8d   :  { %1234 = vmatpush3.bf16.msra.mxu0 %v1369_v19 }
  0x90   :  { %1236 = vmatmul.mubr.bf16.vlgmr.msra.gmra.mrb[0].mxu0 %v157_v24 }
  0x91   :  { %1239 = vmatprep.mubr.bf16.mxu0 %v158_v25 }
  0x98   :  { %1240 = vmatmul.mubr.bf16.gmra.mrb[4].mxu0 %v159_v28 }
  0x99   :  { %1291 = vmatprep.mubr.msk.bf16.mxu0 %vm361_vm0, %v1370_v29 }
  0xf0   :  { %v1816_v31 = vpop.permute.xlu0 %291 }
  0xf1   :  { %v1814_v30 = vpop.permute.xlu1 %301 }
  0xf4   :  { %v1820_v34 = vpop.permute.xlu0 %296 }
  0xf5   :  { %v1818_v32 = vpop.permute.xlu1 %306 }
  0xf8   :  { %v1833_v44 = vpop.permute.xlu0 %311 }
  0xf9   :  { %v1829_v41 = vpop.permute.xlu1 %316 }
  0xfc   :  { %v1847_v54 = vpop.permute.xlu0 %321 }
  0xfd   :  { %v1836_v49 = vpop.permute.xlu1 %326 }
 0x163   :  { %v1237_v33 = vpop.f32.mrb[0].mxu0 }
 0x164   :  { %v258_v35 = vpop.f32.mrb[1].mxu0  ;;  %v331_v42 = vmul.f32 %v1237_v33, %v1814_v30 }
 0x165   :  { %v1238_v36 = vpop.f32.mrb[2].mxu0  ;;  %v329_v38 = vmul.f32 %v1816_v31, %v258_v35 }
 0x166   :  { %v261_v37 = vpop.f32.mrb[3].mxu0  ;;  %v1824_v39 = vmul.f32 %v1238_v36, %v1818_v32 }
 0x167   :  { %v1827_v40 = vmul.f32 %v1820_v34, %v261_v37 }
 0x168   :  { %v338_v45 = vpack.c.bf16 %v1824_v39, %v331_v42 }
 0x169   :  { %v337_v43 = vpack.c.bf16 %v1827_v40, %v329_v38 }
 0x16b   :  { %v1241_v46 = vpop.f32.mrb[4].mxu0  ;;  %1243 = vmatprep.subr.bf16.mxu1 %v337_v43 }
 0x16c   :  { %v274_v47 = vpop.f32.mrb[5].mxu0  ;;  %1244 = vmatpush3.bf16.msra.mxu1 %v337_v43  ;;  %v335_v55 = vmul.f32 %v1241_v46, %v1847_v54 }
 0x16d   :  { %v1242_v48 = vpop.f32.mrb[6].mxu0  ;;  %1245 = vmatprep.subr.bf16.mxu1 %v338_v45  ;;  %v1839_v51 = vmul.f32 %v1833_v44, %v274_v47 }
 0x16e   :  { %v277_v50 = vpop.f32.mrb[7].mxu0  ;;  %v1842_v52 = vmul.f32 %v1242_v48, %v1836_v49 }
 0x16f   :  { %v1845_v53 = vmul.f32 %v1829_v41, %v277_v50 }
 0x170   :  { %1246 = vmatpush3.bf16.msra.mxu1 %v338_v45  ;;  %v340_v57 = vpack.c.bf16 %v1842_v52, %v335_v55 }
 0x171   :  { %v339_v56 = vpack.c.bf16 %v1845_v53, %v1839_v51 }
 0x173   :  { %1247 = vmatprep.subr.bf16.mxu1 %v339_v56 }
 0x174   :  { %1248 = vmatpush3.bf16.msra.mxu1 %v339_v56 }
 0x175   :  { %1249 = vmatprep.subr.bf16.mxu1 %v340_v57 }
 0x178   :  { %1250 = vmatpush3.bf16.msra.mxu1 %v340_v57 }
 0x179   :  { %1259 = vmatprep.subr.bf16.mxu1 %v1374_v58 }
 0x17b   :  { %1252 = vmatmul.mubr.msk.bf16.vlgmr.msra.gmra.mrb[0].mxu1 %vm361_vm0, %v1853_v59 }
 0x17c   :  { %1255 = vmatprep.mubr.msk.bf16.mxu1 %vm361_vm0, %v1855_v60  ;;  %1260 = vmatpush3.bf16.msra.mxu1 %v1374_v58 }
 0x17d   :  { %1261 = vmatprep.subr.bf16.mxu1 %v1375_v61 }
 0x180   :  { %1262 = vmatpush3.bf16.msra.mxu1 %v1375_v61 }
 0x181   :  { %1263 = vmatprep.subr.bf16.mxu1 %v1376_v62 }
 0x183   :  { %1256 = vmatmul.mubr.msk.bf16.gmra.mrb[4].mxu1 %vm361_vm0, %v1861_v63 }
 0x184   :  { %1264 = vmatpush3.bf16.msra.mxu1 %v1376_v62 }
 0x185   :  { %1265 = vmatprep.subr.bf16.mxu1 %v1377_v0 }
 0x188   :  { %1266 = vmatpush3.bf16.msra.mxu1 %v1377_v0 }
 0x189   :  { %1267 = vmatprep.subr.bf16.mxu1 %v1378_v1 }
 0x18c   :  { %1268 = vmatpush3.bf16.msra.mxu1 %v1378_v1 }
 0x18d   :  { %1269 = vmatprep.subr.bf16.mxu1 %v1379_v2 }
 0x190   :  { %1270 = vmatpush3.bf16.msra.mxu1 %v1379_v2 }
 0x191   :  { %1271 = vmatprep.subr.bf16.mxu1 %v1380_v3 }
 0x194   :  { %1272 = vmatpush3.bf16.msra.mxu1 %v1380_v3 }
 0x195   :  { %1273 = vmatprep.subr.bf16.mxu1 %v1381_v4 }
 0x198   :  { %1274 = vmatpush3.bf16.msra.mxu1 %v1381_v4 }
 0x24e   :  { %v1253_v5 = vpop.f32.mrb[0].mxu1 }
 0x24f   :  { %v417_v6 = vadd.f32 %v1253_v5, %v331_v42  ;;  %v408_v7 = vpop.f32.mrb[1].mxu1 }
 0x250   :  { %v409_v9 = vadd.f32 %v408_v7, %v329_v38  ;;  %v1254_v10 = vpop.f32.mrb[2].mxu1 }
 0x251   :  { %v441_v11 = vmul.f32 %v417_v6, %v1814_v30  ;;  %v420_v12 = vadd.f32 %v1254_v10, %v1824_v39  ;;  %v411_v13 = vpop.f32.mrb[3].mxu1 }
 0x252   :  { %v439_v14 = vmul.f32 %v409_v9, %v1816_v31  ;;  %v412_v15 = vadd.f32 %v411_v13, %v1827_v40 }
 0x253   :  { %v456_v16 = vadd.f32 %v1123_v8, %v441_v11  ;;  %v442_v17 = vmul.f32 %v420_v12, %v1818_v32 }
 0x254   :  { %v454_v18 = vadd.f32 %v1123_v8, %v439_v14  ;;  %v440_v19 = vmul.f32 %v412_v15, %v1820_v34 }
 0x255   :  { %v457_v20 = vadd.f32 %v1123_v8, %v442_v17  ;;  %v464_v23 = vmax.f32 %v456_v16, 0.0  ;;  %v1382_v17 = vld [vmem:[#allocation11] sm:$0xff]  }
 0x256   :  { %v455_v21 = vadd.f32 %v1123_v8, %v440_v19  ;;  %v1257_v22 = vpop.f32.mrb[4].mxu1  ;;  %v462_v27 = vmax.f32 %v454_v18, 0.0  ;;  %v1383_v18 = vld [vmem:[#allocation11 + $0x8] sm:$0xff]   ;;  %v1384_v19 = vld [vmem:[#allocation11 + $0x10] sm:$0xff]  }
 0x257   :  { %v465_v24 = vmax.f32 %v457_v20, 0.0  ;;  %v433_v25 = vadd.f32 %v1257_v22, %v335_v55  ;;  %v424_v26 = vpop.f32.mrb[5].mxu1  ;;  %v1385_v20 = vld [vmem:[#allocation11 + $0x18] sm:$0xff]   ;;  %v1387_v22 = vld [vmem:[#allocation11 + $0x28] sm:$0xff]  }
 0x258   :  { %v463_v28 = vmax.f32 %v455_v21, 0.0  ;;  %v425_v29 = vadd.f32 %v424_v26, %v1839_v51  ;;  %v1258_v33 = vpop.f32.mrb[6].mxu1  ;;  %v1386_v21 = vld [vmem:[#allocation11 + $0x20] sm:$0xff]  }
 0x259   :  { %v471_v35 = vpack.c.bf16 %v465_v24, %v464_v23  ;;  %v445_v36 = vmul.f32 %v433_v25, %v1847_v54  ;;  %v436_v37 = vadd.f32 %v1258_v33, %v1842_v52  ;;  %v427_v38 = vpop.f32.mrb[7].mxu1  ;;  %v1390_v23 = vld [vmem:[#allocation12] sm:$0xff]   ;;  %v1391_v24 = vld [vmem:[#allocation12 + $0x8] sm:$0xff]   ;;  %v1393_v25 = vld [vmem:[#allocation12 + $0x18] sm:$0xff]  }
 0x25a   :  { %v443_v39 = vmul.f32 %v425_v29, %v1833_v44  ;;  %v428_v40 = vadd.f32 %v427_v38, %v1845_v53  ;;  %v470_v42 = vpack.c.bf16 %v463_v28, %v462_v27  ;;  %1323 = vmatprep.subr.bf16.mxu1 %v1390_v23  ;;  %v1394_v26 = vld [vmem:[#allocation12 + $0x20] sm:$0xff]  }
 0x25b   :  { %v460_v43 = vadd.f32 %v1123_v8, %v445_v36  ;;  %v446_v45 = vmul.f32 %v436_v37, %v1836_v49 }
 0x25c   :  { %v458_v46 = vadd.f32 %v1123_v8, %v443_v39  ;;  %v444_v47 = vmul.f32 %v428_v40, %v1829_v41  ;;  %1275 = vmatprep.mubr.bf16.mxu1 %v470_v42  ;;  %v1136_v39 = vld [vmem:[%s1981_s7] ss:$0 sm:$0xff] }
 0x25d   :  { %v461_v48 = vadd.f32 %v1123_v8, %v446_v45  ;;  %1276 = vmatmul.mubr.bf16.vlgmr.msra.gmra.mrb[8].mxu1 %v471_v35  ;;  %v468_v51 = vmax.f32 %v460_v43, 0.0 }
 0x25e   :  { %v459_v50 = vadd.f32 %v1123_v8, %v444_v47  ;;  %v466_v56 = vmax.f32 %v458_v46, 0.0  ;;  %1324 = vmatpush3.bf16.msra.mxu1 %v1390_v23 }
 0x25f   :  { %v469_v55 = vmax.f32 %v461_v48, 0.0  ;;  %1325 = vmatprep.subr.bf16.mxu1 %v1391_v24 }
 0x260   :  { %v467_v52 = vmax.f32 %v459_v50, 0.0 }
 0x261   :  { %v473_v57 = vpack.c.bf16 %v469_v55, %v468_v51 }
 0x262   :  { %v472_v58 = vpack.c.bf16 %v467_v52, %v466_v56  ;;  %1326 = vmatpush3.bf16.msra.mxu1 %v1391_v24 }
 0x264   :  { %1279 = vmatprep.mubr.bf16.mxu1 %v472_v58 }
 0x265   :  { %1280 = vmatmul.mubr.bf16.gmra.mrb[12].mxu1 %v473_v57 }
 0x330   :  { %v1277_v53 = vpop.f32.mrb[8].mxu1 }
 0x331   :  { %v572_v61 = vpop.f32.mrb[9].mxu1  ;;  %v1891_v4 = vmul.f32 %v1277_v53, %v1814_v30 }
 0x332   :  { %v1278_v62 = vpop.f32.mrb[10].mxu1  ;;  %v1882_v1 = vmul.f32 %v572_v61, %v1816_v31 }
 0x333   :  { %v575_v0 = vpop.f32.mrb[11].mxu1  ;;  %v1885_v2 = vmul.f32 %v1278_v62, %v1818_v32 }
 0x334   :  { %v1888_v3 = vmul.f32 %v575_v0, %v1820_v34 }
 0x335   :  { %v612_v6 = vpack.c.bf16 %v1885_v2, %v1891_v4 }
 0x336   :  { %v611_v5 = vpack.c.bf16 %v1888_v3, %v1882_v1 }
 0x338   :  { %v1281_v7 = vpop.f32.mrb[12].mxu1  ;;  %1283 = vmatprep.subr.bf16.mxu0 %v611_v5 }
 0x339   :  { %v588_v8 = vpop.f32.mrb[13].mxu1  ;;  %1284 = vmatpush3.bf16.msra.mxu0 %v611_v5  ;;  %v1907_v14 = vmul.f32 %v1281_v7, %v1847_v54  ;;  %v1397_v7 = vld [vmem:[#allocation12 + $0x38] sm:$0xff]  }
 0x33a   :  { %v1282_v9 = vpop.f32.mrb[14].mxu1  ;;  %1285 = vmatprep.subr.bf16.mxu0 %v612_v6  ;;  %v1898_v11 = vmul.f32 %v588_v8, %v1833_v44  ;;  %v852_v8 = vstv %s1984_s10 }
 0x33b   :  { %v591_v10 = vpop.f32.mrb[15].mxu1  ;;  %v1901_v12 = vmul.f32 %v1282_v9, %v1836_v49 }
 0x33c   :  { %v1904_v13 = vmul.f32 %v591_v10, %v1829_v41 }
 0x33d   :  { %1286 = vmatpush3.bf16.msra.mxu0 %v612_v6  ;;  %v614_v16 = vpack.c.bf16 %v1901_v12, %v1907_v14 }
 0x33e   :  { %v613_v15 = vpack.c.bf16 %v1904_v13, %v1898_v11 }
 0x340   :  { %1287 = vmatprep.subr.bf16.mxu0 %v613_v15 }
 0x341   :  { %1288 = vmatpush3.bf16.msra.mxu0 %v613_v15 }
 0x342   :  { %1289 = vmatprep.subr.bf16.mxu0 %v614_v16 }
 0x345   :  { %1290 = vmatpush3.bf16.msra.mxu0 %v614_v16 }
 0x346   :  { %1299 = vmatprep.subr.bf16.mxu0 %v1382_v17 }
 0x348   :  { %1292 = vmatmul.mubr.msk.bf16.vlgmr.msra.gmra.mrb[8].mxu0 %vm361_vm0, %v1853_v59  ;;  %v1388_v59 = vld [vmem:[#allocation11 + $0x30] sm:$0xff]  }
 0x349   :  { %1295 = vmatprep.mubr.msk.bf16.mxu0 %vm361_vm0, %v1855_v60  ;;  %1300 = vmatpush3.bf16.msra.mxu0 %v1382_v17  ;;  %v1389_v60 = vld [vmem:[#allocation11 + $0x38] sm:$0xff]  }
 0x34a   :  { %1301 = vmatprep.subr.bf16.mxu0 %v1383_v18 }
 0x34d   :  { %1302 = vmatpush3.bf16.msra.mxu0 %v1383_v18 }
 0x34e   :  { %1303 = vmatprep.subr.bf16.mxu0 %v1384_v19 }
 0x350   :  { %1296 = vmatmul.mubr.msk.bf16.gmra.mrb[12].mxu0 %vm361_vm0, %v1861_v63  ;;  %v1392_v63 = vld [vmem:[#allocation12 + $0x10] sm:$0xff]  }
 0x351   :  { %1304 = vmatpush3.bf16.msra.mxu0 %v1384_v19  ;;  %1327 = vmatprep.subr.bf16.mxu1 %v1392_v63 }
 0x352   :  { %1305 = vmatprep.subr.bf16.mxu0 %v1385_v20  ;;  %1328 = vmatpush3.bf16.msra.mxu1 %v1392_v63 }
 0x353   :  { %1329 = vmatprep.subr.bf16.mxu1 %v1393_v25 }
 0x355   :  { %1306 = vmatpush3.bf16.msra.mxu0 %v1385_v20 }
 0x356   :  { %1307 = vmatprep.subr.bf16.mxu0 %v1386_v21  ;;  %1330 = vmatpush3.bf16.msra.mxu1 %v1393_v25 }
 0x357   :  { %1331 = vmatprep.subr.bf16.mxu1 %v1394_v26 }
 0x359   :  { %1308 = vmatpush3.bf16.msra.mxu0 %v1386_v21 }
 0x35a   :  { %1309 = vmatprep.subr.bf16.mxu0 %v1387_v22  ;;  %1332 = vmatpush3.bf16.msra.mxu1 %v1394_v26 }
 0x35d   :  { %1310 = vmatpush3.bf16.msra.mxu0 %v1387_v22 }
 0x35e   :  { %1311 = vmatprep.subr.bf16.mxu0 %v1388_v59 }
 0x361   :  { %1312 = vmatpush3.bf16.msra.mxu0 %v1388_v59 }
 0x362   :  { %1313 = vmatprep.subr.bf16.mxu0 %v1389_v60 }
 0x365   :  { %1314 = vmatpush3.bf16.msra.mxu0 %v1389_v60 }
 0x41b   :  { %v1293_v27 = vpop.f32.mrb[8].mxu0 }
 0x41c   :  { %v658_v28 = vadd.f32 %v1293_v27, %v1891_v4  ;;  %v649_v29 = vpop.f32.mrb[9].mxu0 }
 0x41d   :  { %v650_v33 = vadd.f32 %v649_v29, %v1882_v1  ;;  %v1294_v35 = vpop.f32.mrb[10].mxu0 }
 0x41e   :  { %v682_v36 = vmul.f32 %v658_v28, %v1814_v30  ;;  %v661_v37 = vadd.f32 %v1294_v35, %v1885_v2  ;;  %v652_v38 = vpop.f32.mrb[11].mxu0 }
 0x41f   :  { %v680_v40 = vmul.f32 %v650_v33, %v1816_v31  ;;  %v653_v42 = vadd.f32 %v652_v38, %v1888_v3 }
 0x420   :  { %v683_v43 = vmul.f32 %v661_v37, %v1818_v32  ;;  %v697_v46 = vadd.f32 %v1136_v39, %v682_v36 }
 0x421   :  { %v681_v45 = vmul.f32 %v653_v42, %v1820_v34  ;;  %v695_v48 = vadd.f32 %v1136_v39, %v680_v40 }
 0x422   :  { %v698_v47 = vadd.f32 %v1136_v39, %v683_v43 }
 0x423   :  { %v696_v50 = vadd.f32 %v1136_v39, %v681_v45  ;;  %v1297_v30 = vpop.f32.mrb[12].mxu0 }
 0x424   :  { %v704_v51 = vpack.c.bf16 %v698_v47, %v697_v46  ;;  %v674_v55 = vadd.f32 %v1297_v30, %v1907_v14  ;;  %v665_v56 = vpop.f32.mrb[13].mxu0  ;;  %v1146_v47 = vld [vmem:[%s1986_s12] ss:$0 sm:$0xff]  ;;  %s1597_s12 = smov [#allocation15]  }
 0x425   :  { %v666_v52 = vadd.f32 %v665_v56, %v1898_v11  ;;  %v1298_v57 = vpop.f32.mrb[14].mxu0  ;;  %v703_v58 = vpack.c.bf16 %v696_v50, %v695_v48  ;;  %s1088_s16 = sshll.u32 %s1597_s12, 4  ;;  %s1089_s16 = int_to_ptr.vmem [resolvable:$true] %s1088_s16 }
 0x426   :  { %v686_v31 = vmul.f32 %v674_v55, %v1847_v54  ;;  %v677_v53 = vadd.f32 %v1298_v57, %v1901_v12  ;;  %v668_v32 = vpop.f32.mrb[15].mxu0  ;;  %v1395_v54 = vld [vmem:[#allocation12 + $0x28] sm:$0xff]   ;;  %s1530_s17 = scalar_lea.vmem %s1089_s16, 1024  ;;  %p1535_p7 = scmp.lt.s32.totalorder %s1089_s16, %s1089_s16 }
 0x427   :  { %v684_v34 = vmul.f32 %v666_v52, %v1833_v44  ;;  %v669_v61 = vadd.f32 %v668_v32, %v1904_v13  ;;  %1315 = vmatprep.mubr.bf16.mxu0 %v703_v58  ;;  %1333 = vmatprep.subr.bf16.mxu1 %v1395_v54  ;;  %v1396_v44 = vld [vmem:[#allocation12 + $0x30] sm:$0xff]   ;;  %v1018_v58 = vld [vmem:[#allocation6 + $0x8] sm:$0xff]  ;;  %p1531_p6 = scmp.ne.s32.totalorder %s1089_s16, %s1530_s17  ;;  %p1536_p8 = scmp.lt.s32.totalorder %s1530_s17, %s1530_s17 }
 0x428   :  { %v687_v62 = vmul.f32 %v677_v53, %v1836_v49  ;;  %1316 = vmatmul.mubr.bf16.vlgmr.msra.gmra.mrb[16].mxu0 %v704_v51  ;;  %v701_v1 = vadd.f32 %v1136_v39, %v686_v31  ;;  %1334 = vmatpush3.bf16.msra.mxu1 %v1395_v54  ;;  %v1017_v51 = vld [vmem:[#allocation6] sm:$0xff]  ;;  %v1019_v31 = vld [vmem:[#allocation6 + $0x10] sm:$0xff] }
 0x429   :  { %v685_v0 = vmul.f32 %v669_v61, %v1829_v41  ;;  %v699_v3 = vadd.f32 %v1136_v39, %v684_v34  ;;  %1335 = vmatprep.subr.bf16.mxu1 %v1396_v44  ;;  %v1137_v41 = vld [vmem:[%s1983_s9] ss:$0 sm:$0xff]  ;;  %p1537_p9 = por %p1536_p8, %p1535_p7 }
 0x42a   :  { %v702_v2 = vadd.f32 %v1136_v39, %v687_v62 }
 0x42b   :  { %v700_v4 = vadd.f32 %v1136_v39, %v685_v0  ;;  %v1020_v0 = vld [vmem:[#allocation6 + $0x18] sm:$0xff]  ;;  %p1538_p10 = pnand %p1537_p9, %p1531_p6 }
 0x42c   :  { %v706_v5 = vpack.c.bf16 %v702_v2, %v701_v1  ;;  %1336 = vmatpush3.bf16.msra.mxu1 %v1396_v44 }
 0x42d   :  { %v705_v6 = vpack.c.bf16 %v700_v4, %v699_v3  ;;  %1337 = vmatprep.subr.bf16.mxu1 %v1397_v7 }
 0x42f   :  { %1319 = vmatprep.mubr.bf16.mxu0 %v705_v6 }
 0x430   :  { %1320 = vmatmul.mubr.bf16.gmra.mrb[20].mxu0 %v706_v5  ;;  %1338 = vmatpush3.bf16.msra.mxu1 %v1397_v7  ;;  %v1021_v5 = vld [vmem:[#allocation6 + $0x20] sm:$0xff] }
 0x4fb   :  { %v1317_v49 = vpop.f32.mrb[16].mxu0 }
 0x4fc   :  { %v821_v9 = vadd.f32 %v1317_v49, %v1137_v41  ;;  %v812_v10 = vpop.f32.mrb[17].mxu0 }
 0x4fd   :  { %v813_v11 = vadd.f32 %v1137_v41, %v812_v10  ;;  %v1318_v12 = vpop.f32.mrb[18].mxu0 }
 0x4fe   :  { %v855_v13 = vmul.f32 %v852_v8, %v821_v9  ;;  %v824_v14 = vadd.f32 %v1318_v12, %v1137_v41  ;;  %v815_v15 = vpop.f32.mrb[19].mxu0  ;;  %vm846_vm1 = vcmp.gt.f32.partialorder %v821_v9, 0.0 }
 0x4ff   :  { %v853_v16 = vmul.f32 %v852_v8, %v813_v11  ;;  %v816_v17 = vadd.f32 %v1137_v41, %v815_v15  ;;  %vm844_vm2 = vcmp.gt.f32.partialorder %v813_v11, 0.0 }
 0x500   :  { %vm847_vm3 = vcmp.gt.f32.partialorder %v824_v14, 0.0  ;;  %v856_v18 = vmul.f32 %v852_v8, %v824_v14  ;;  %v863_v20 = vsel %vm846_vm1, %v821_v9, %v855_v13  ;;  %v1022_v9 = vld [vmem:[#allocation6 + $0x28] sm:$0xff] }
 0x501   :  { %vm845_vm4 = vcmp.gt.f32.partialorder %v816_v17, 0.0  ;;  %v854_v19 = vmul.f32 %v852_v8, %v816_v17  ;;  %v861_v60 = vsel %vm844_vm2, %v813_v11, %v853_v16  ;;  %v1024_v16 = vld [vmem:[#allocation6 + $0x38] sm:$0xff] }
 0x502   :  { %v864_v21 = vsel %vm847_vm3, %v824_v14, %v856_v18 }
 0x503   :  { %v870_v22 = vpack.c.bf16 %v864_v21, %v863_v20  ;;  %v1321_v59 = vpop.f32.mrb[20].mxu0  ;;  %v862_v23 = vsel %vm845_vm4, %v816_v17, %v854_v19 }
 0x504   :  { %v837_v24 = vadd.f32 %v1321_v59, %v1137_v41  ;;  %v828_v63 = vpop.f32.mrb[21].mxu0  ;;  %v869_v25 = vpack.c.bf16 %v862_v23, %v861_v60 }
 0x505   :  { %v829_v26 = vadd.f32 %v1137_v41, %v828_v63  ;;  %v1322_v27 = vpop.f32.mrb[22].mxu0 }
 0x506   :  { %v859_v28 = vmul.f32 %v852_v8, %v837_v24  ;;  %v840_v29 = vadd.f32 %v1322_v27, %v1137_v41  ;;  %v831_v33 = vpop.f32.mrb[23].mxu0  ;;  %1339 = vmatprep.mubr.bf16.mxu1 %v869_v25  ;;  %vm850_vm5 = vcmp.gt.f32.partialorder %v837_v24, 0.0 }
 0x507   :  { %v857_v35 = vmul.f32 %v852_v8, %v829_v26  ;;  %v832_v36 = vadd.f32 %v1137_v41, %v831_v33  ;;  %1340 = vmatmul.mubr.bf16.vlgmr.msra.gmra.mrb[16].mxu1 %v870_v22  ;;  %vm848_vm6 = vcmp.gt.f32.partialorder %v829_v26, 0.0 }
 0x508   :  { %vm851_vm7 = vcmp.gt.f32.partialorder %v840_v29, 0.0  ;;  %v860_v37 = vmul.f32 %v852_v8, %v840_v29  ;;  %v867_v39 = vsel %vm850_vm5, %v837_v24, %v859_v28 }
 0x509   :  { %vm849_vm8 = vcmp.gt.f32.partialorder %v832_v36, 0.0  ;;  %v858_v38 = vmul.f32 %v852_v8, %v832_v36  ;;  %v865_v42 = vsel %vm848_vm6, %v829_v26, %v857_v35  ;;  %v1023_v8 = vld [vmem:[#allocation6 + $0x30] sm:$0xff] }
 0x50a   :  { %v868_v40 = vsel %vm851_vm7, %v840_v29, %v860_v37 }
 0x50b   :  { %v866_v43 = vsel %vm849_vm8, %v832_v36, %v858_v38  ;;  %v872_v45 = vpack.c.bf16 %v868_v40, %v867_v39 }
 0x50c   :  { %v871_v46 = vpack.c.bf16 %v866_v43, %v865_v42 }
 0x50e   :  { %1343 = vmatprep.mubr.bf16.mxu1 %v871_v46 }
 0x50f   :  { %1344 = vmatmul.mubr.bf16.gmra.mrb[20].mxu1 %v872_v45 }
 0x5da   :  { %v1341_v48 = vpop.f32.mrb[16].mxu1 }
 0x5db   :  { %v987_v50 = vadd.f32 %v1341_v48, %v1146_v47  ;;  %v978_v30 = vpop.f32.mrb[17].mxu1 }
 0x5dc   :  { %v979_v55 = vadd.f32 %v1146_v47, %v978_v30  ;;  %v1342_v56 = vpop.f32.mrb[18].mxu1 }
 0x5dd   :  { %1011 = vst [vmem:[#allocation15 + $0x10] sm:$0xff] %v987_v50  ;;  %v990_v52 = vadd.f32 %v1342_v56, %v1146_v47  ;;  %v981_v57 = vpop.f32.mrb[19].mxu1  ;;  %v1027_v62 = vsub.f32 %v987_v50, %v1019_v31 }
 0x5de   :  { %1009 = vst [vmem:[#allocation15] sm:$0xff] %v979_v55  ;;  %v982_v53 = vadd.f32 %v1146_v47, %v981_v57  ;;  %v1025_v32 = vsub.f32 %v979_v55, %v1017_v51 }
 0x5df   :  { %1012 = vst [vmem:[#allocation15 + $0x18] sm:$0xff] %v990_v52  ;;  %v1035_v44 = vmul.f32 %v1027_v62, %v1027_v62  ;;  %v1028_v7 = vsub.f32 %v990_v52, %v1020_v0 }
 0x5e0   :  { %1010 = vst [vmem:[#allocation15 + $0x8] sm:$0xff] %v982_v53  ;;  %v1033_v34 = vmul.f32 %v1025_v32, %v1025_v32  ;;  %v1026_v61 = vsub.f32 %v982_v53, %v1018_v58 }
 0x5e1   :  { %v1036_v13 = vmul.f32 %v1028_v7, %v1028_v7 }
 0x5e2   :  { %v1345_v1 = vpop.f32.mrb[20].mxu1  ;;  %1041 = vadd.xlane.f32.xlu0 %v1033_v34  ;;  %v1034_v2 = vmul.f32 %v1026_v61, %v1026_v61 }
 0x5e3   :  { %v1003_v3 = vadd.f32 %v1345_v1, %v1146_v47  ;;  %v994_v4 = vpop.f32.mrb[21].mxu1 }
 0x5e4   :  { %v995_v6 = vadd.f32 %v1146_v47, %v994_v4  ;;  %v1346_v54 = vpop.f32.mrb[22].mxu1  ;;  %1043 = vadd.xlane.f32.xlu1 %v1034_v2 }
 0x5e5   :  { %1015 = vst [vmem:[#allocation15 + $0x30] sm:$0xff] %v1003_v3  ;;  %v1006_v41 = vadd.f32 %v1346_v54, %v1146_v47  ;;  %v997_v49 = vpop.f32.mrb[23].mxu1  ;;  %v1031_v14 = vsub.f32 %v1003_v3, %v1023_v8 }
 0x5e6   :  { %1013 = vst [vmem:[#allocation15 + $0x20] sm:$0xff] %v995_v6  ;;  %v998_v10 = vadd.f32 %v1146_v47, %v997_v49  ;;  %1045 = vadd.xlane.f32.xlu0 %v1035_v44  ;;  %v1029_v11 = vsub.f32 %v995_v6, %v1021_v5 }
 0x5e7   :  { %1016 = vst [vmem:[#allocation15 + $0x38] sm:$0xff] %v1006_v41  ;;  %v1039_v17 = vmul.f32 %v1031_v14, %v1031_v14  ;;  %v1032_v19 = vsub.f32 %v1006_v41, %v1024_v16 }
 0x5e8   :  { %1014 = vst [vmem:[#allocation15 + $0x28] sm:$0xff] %v998_v10  ;;  %v1037_v12 = vmul.f32 %v1029_v11, %v1029_v11  ;;  %v1030_v15 = vsub.f32 %v998_v10, %v1022_v9 }
 0x5e9   :  { %v1040_v20 = vmul.f32 %v1032_v19, %v1032_v19 }
 0x5ea   :  { %1049 = vadd.xlane.f32.xlu1 %v1037_v12  ;;  %1047 = vadd.xlane.f32.xlu0 %v1036_v13  ;;  %v1038_v18 = vmul.f32 %v1030_v15, %v1030_v15 }
 0x5ee   :  { %1053 = vadd.xlane.f32.xlu1 %v1039_v17  ;;  %1051 = vadd.xlane.f32.xlu0 %v1038_v18 }
 0x5f2   :  { %1055 = vadd.xlane.f32.xlu0 %v1040_v20 }
 0x5f3   :  { %1541 = shalt.err (!%p1538_p10)
}
 0x5f4   :  { %s1542_s11 = scalar_lea.hbm %s1988_s14, 1024 }
 0x5f5   :  { %p1543_p11 = scmp.ne.s32.totalorder %s1988_s14, %s1542_s11  ;;  %p1546_p12 = scmp.lt.u32.totalorder %s1542_s11, %s1988_s14 }
 0x5f7   :  { %p1548_p13 = pnand %p1546_p12, %p1543_p11 }
 0x5f9   :  { %1551 = shalt.err (!%p1548_p13)
}
 0x5fa   :  { %1094 = dma.vmem_to_hbm [thread:$0]  %s1089_s16, 1024, %s1988_s14, [#allocation16], %s1587_s23, %s1587_s23, %s1588_s24   ;;  %vm1071_vm9 = vcmask 0  }
 0x5fb   :  { %s1598_s14 = smov [#allocation14]  }
 0x5fc   :  { %s1079_s23 = sshll.u32 %s1598_s14, 4  ;;  %s1080_s23 = int_to_ptr.vmem [resolvable:$true] %s1079_s23 }
 0x5fd   :  { %s1552_s24 = scalar_lea.vmem %s1080_s23, 16  ;;  %s1556_s1 = scalar_lea.vmem %s1080_s23, 32 }
 0x5fe   :  { %p1553_p0 = scmp.ne.s32.totalorder %s1080_s23, %s1552_s24  ;;  %p1557_p1 = scmp.lt.s32.totalorder %s1080_s23, %s1080_s23 }
 0x5ff   :  { %p1558_p2 = scmp.lt.s32.totalorder %s1556_s1, %s1552_s24 }
 0x601   :  { %p1559_p3 = por %p1558_p2, %p1557_p1 }
 0x603   :  { %p1560_p4 = pnand %p1559_p3, %p1553_p0 }
 0x66f   :  { %v1042_v21 = vpop.xlane.xlu0 %1041 }
 0x671   :  { %v1044_v22 = vpop.xlane.xlu1 %1043 }
 0x672   :  { %v1057_v59 = vadd.f32 %v1044_v22, %v1042_v21 }
 0x673   :  { %v1046_v60 = vpop.xlane.xlu0 %1045 }
 0x674   :  { %v1058_v23 = vadd.f32 %v1057_v59, %v1046_v60 }
 0x677   :  { %v1050_v24 = vpop.xlane.xlu1 %1049  ;;  %v1048_v63 = vpop.xlane.xlu0 %1047 }
 0x678   :  { %v1059_v25 = vadd.f32 %v1058_v23, %v1048_v63 }
 0x67a   :  { %v1060_v26 = vadd.f32 %v1059_v25, %v1050_v24 }
 0x67b   :  { %v1052_v27 = vpop.xlane.xlu0 %1051  ;;  %v1054_v29 = vpop.xlane.xlu1 %1053 }
 0x67c   :  { %v1061_v28 = vadd.f32 %v1060_v26, %v1052_v27 }
 0x67e   :  { %v1062_v33 = vadd.f32 %v1061_v28, %v1054_v29 }
 0x67f   :  { %v1056_v35 = vpop.xlane.xlu0 %1055 }
 0x680   :  { %v1063_v36 = vadd.f32 %v1062_v33, %v1056_v35 }
 0x682   :  { %v1064_v37 = vrot.slane %v1063_v36, 4 }
 0x684   :  { %v1065_v38 = vadd.f32 %v1064_v37, %v1063_v36 }
 0x686   :  { %v1066_v39 = vrot.slane %v1065_v38, 2 }
 0x688   :  { %v1067_v40 = vadd.f32 %v1066_v39, %v1065_v38 }
 0x68a   :  { %v1068_v42 = vrot.slane %v1067_v40, 1 }
 0x68c   :  { %v1069_v43 = vadd.f32 %v1068_v42, %v1067_v40 }
 0x68e   :  { %v1070_v45 = vmul.f32 0.00048828125, %v1069_v43 }
 0x690   :  { %1072 = vst.msk [vmem:[#allocation14] sm:$0x1] %vm1071_vm9, %v1070_v45 }
 0x691   :  { %1563 = shalt.err (!%p1560_p4)
}
 0x692   :  { %s1564_s22 = scalar_lea.hbm %s1987_s13, 16 }
 0x693   :  { %p1565_p5 = scmp.ne.s32.totalorder %s1987_s13, %s1564_s22  ;;  %p1568_p6 = scmp.lt.u32.totalorder %s1564_s22, %s1987_s13 }
 0x695   :  { %p1570_p7 = pnand %p1568_p6, %p1565_p5 }
 0x697   :  { %1573 = shalt.err (!%p1570_p7)
}
 0x698   :  { %1082 = dma.vmem_to_hbm [thread:$0]  %s1080_s23, 16, %s1987_s13, [#allocation5]  }
 0x699   :  { %1582 = dma.done.wait [#allocation5], 16  }
 0x69a   :  { %1583 = vsyncadd [#allocation5], 4294967280 }
 0x69b   :  { %1584 = dma.done.wait [#allocation16], 1024  }
 0x69c   :  { %1585 = vsyncadd [#allocation16], 4294966272 }
 0x69d   :  { %1101 = vsyncpa [#allocation4], 1 }
 0x69e   :  { %1102 = vsyncpa [#allocation7], 1 }
 0x69f   :  { %1103 = vsyncpa [#allocation10], 1 }
 0x6a0   :  { %1104 = vsyncpa [#allocation13], 1 }
 0x6a1   :  { %1105 = vsyncpa [#allocation5], 1 }
 0x6a2   :  { %1106 = vsyncpa [#allocation16], 1 }

</bundles_post_ra>
